<compile_context>
chip_gen: v7x
topology: tpu7x:2x2x1
jax: 0.10.0
libtpu: 0.0.40
codegen_flags: <defaults>
</compile_context>

<pallas_src>
from functools import partial

import jax
import jax.numpy as jnp
from jax import lax
from jax.experimental import pallas as pl
from jax.experimental.pallas import tpu as pltpu


def _mbconv_kernel(x_ref, w1_ref, b1_ref, wd_ref, bd_ref, w2_ref, b2_ref,
                   m_ref, o_ref, *, W):
    # x_ref : (1, C, HW)      image n, channels on sublanes, pixels on lanes
    # w1    : (Cmid, C)       folded expand conv
    # b1    : (Cmid, 1)
    # wd    : (Cmid, 9)       folded depthwise taps, tap k = 3*(ky+1)+(kx+1)
    # bd    : (Cmid, 1)
    # w2    : (C, Cmid)       folded project conv
    # b2    : (C, 1)
    # m_ref : (9, HW)         precomputed boundary masks per tap (0/1 float)
    # o_ref : (1, C, HW)
    x = x_ref[0]                                           # (C, HW)
    HW = x.shape[1]

    # ---- 1x1 expand + BN + ReLU6 (MXU) ----
    h = jnp.dot(w1_ref[...], x, preferred_element_type=jnp.float32)
    h = jnp.clip(h + b1_ref[...], 0.0, 6.0)                # (Cmid, HW)

    # ---- 3x3 depthwise + BN + ReLU6 (VPU + XLU lane rolls) ----
    wd = wd_ref[...]                                       # (Cmid, 9)
    acc = jnp.zeros(h.shape, jnp.float32)
    for k in range(9):
        ky = k // 3 - 1
        kx = k % 3 - 1
        d = ky * W + kx                                    # flat pixel offset
        # shifted[p] = h[p + d]  (wrapped lanes are zeroed by the mask)
        shifted = h if d == 0 else pltpu.roll(h, (-d) % HW, axis=1)
        acc = acc + (shifted * m_ref[k:k + 1, :]) * wd[:, k:k + 1]
    hd = jnp.clip(acc + bd_ref[...], 0.0, 6.0)             # (Cmid, HW)

    # ---- 1x1 project + BN (MXU) + residual add ----
    y = jnp.dot(w2_ref[...], hd, preferred_element_type=jnp.float32)
    o_ref[0] = (y + b2_ref[...] + x).astype(o_ref.dtype)   # lane-dense store


def _make_dw_masks(H, W):
    """(9, H*W) 0/1 float masks: tap k valid at flat pixel p?"""
    r = jnp.arange(H * W, dtype=jnp.int32) // W
    c = jnp.arange(H * W, dtype=jnp.int32) % W
    ones = jnp.ones((H * W,), jnp.float32)
    rows = []
    for ky in (-1, 0, 1):
        if ky == -1:
            rm = (r >= 1).astype(jnp.float32)
        elif ky == 1:
            rm = (r <= H - 2).astype(jnp.float32)
        else:
            rm = ones
        for kx in (-1, 0, 1):
            if kx == -1:
                cm = (c >= 1).astype(jnp.float32)
            elif kx == 1:
                cm = (c <= W - 2).astype(jnp.float32)
            else:
                cm = ones
            rows.append(rm * cm)
    return jnp.stack(rows, axis=0)


def mobile_inverted_residual_block(x, params):
    """x: (N, C, H, W) float32 (NCHW).  Returns mobile_inverted_conv(x) + x."""
    N, C, H, W = x.shape
    HW = H * W
    w1, b1 = params["w1"], params["b1"]
    wd, bd = params["wd"], params["bd"]
    w2, b2 = params["w2"], params["b2"]
    Cmid = w1.shape[0]

    xf = x.reshape(N, C, HW)            # wrapper-side flatten (free, row-major)
    masks = _make_dw_masks(H, W)        # (9, HW)

    out = pl.pallas_call(
        partial(_mbconv_kernel, W=W),
        out_shape=jax.ShapeDtypeStruct((N, C, HW), jnp.float32),
        grid_spec=pltpu.PrefetchScalarGridSpec(
            num_scalar_prefetch=0,
            grid=(N,),
            in_specs=[
                pl.BlockSpec((1, C, HW), lambda n: (n, 0, 0)),
                pl.BlockSpec((Cmid, C), lambda n: (0, 0)),
                pl.BlockSpec((Cmid, 1), lambda n: (0, 0)),
                pl.BlockSpec((Cmid, 9), lambda n: (0, 0)),
                pl.BlockSpec((Cmid, 1), lambda n: (0, 0)),
                pl.BlockSpec((C, Cmid), lambda n: (0, 0)),
                pl.BlockSpec((C, 1), lambda n: (0, 0)),
                pl.BlockSpec((9, HW), lambda n: (0, 0)),
            ],
            out_specs=pl.BlockSpec((1, C, HW), lambda n: (n, 0, 0)),
        ),
        compiler_params=pltpu.CompilerParams(
            dimension_semantics=("parallel",)),   # v7x: shard batch over 2 TCs
    )(xf, w1, b1, wd, bd, w2, b2, masks)
    return out.reshape(N, C, H, W)


def make_params(key, C, Cmid, eps=1e-5):
    """Deterministic synthetic params, BN folded, kernel-ready layouts."""
    ks = jax.random.split(key, 6)
    w1_t = jax.random.normal(ks[0], (Cmid, C, 1, 1), jnp.float32) * 0.3   # expand (OIHW)
    wd_t = jax.random.normal(ks[1], (Cmid, 1, 3, 3), jnp.float32) * 0.3   # depthwise
    w2_t = jax.random.normal(ks[2], (C, Cmid, 1, 1), jnp.float32) * 0.3   # project

    def bn(k, ch):
        k1, k2, k3, k4 = jax.random.split(k, 4)
        gamma = 1.0 + 0.1 * jax.random.normal(k1, (ch,), jnp.float32)
        beta = 0.1 * jax.random.normal(k2, (ch,), jnp.float32)
        mean = 0.1 * jax.random.normal(k3, (ch,), jnp.float32)
        var = 1.0 + 0.1 * jax.random.uniform(k4, (ch,), jnp.float32)
        scale = gamma / jnp.sqrt(var + eps)
        return scale, beta - mean * scale

    s1, t1 = bn(ks[3], Cmid)
    sd, td = bn(ks[4], Cmid)
    s2, t2 = bn(ks[5], C)

    w1 = w1_t[:, :, 0, 0] * s1[:, None]                    # (Cmid, C)
    b1 = t1.reshape(Cmid, 1)
    wd = wd_t[:, 0].reshape(Cmid, 9) * sd[:, None]         # (Cmid, 9) taps row-major
    bd = td.reshape(Cmid, 1)
    w2 = w2_t[:, :, 0, 0] * s2[:, None]                    # (C, Cmid)
    b2 = t2.reshape(C, 1)
    return dict(w1=w1, b1=b1, wd=wd, bd=bd, w2=w2, b2=b2)


def reference(x, p):
    """Pure-JAX (lax.conv) reference of the same MBConv block, NCHW."""
    N, C, H, W = x.shape
    Cmid = p["w1"].shape[0]
    dn = ("NCHW", "OIHW", "NCHW")
    h = lax.conv_general_dilated(
        x, p["w1"].reshape(Cmid, C, 1, 1), (1, 1), "SAME",
        dimension_numbers=dn) + p["b1"].reshape(1, Cmid, 1, 1)
    h = jnp.clip(h, 0.0, 6.0)
    hd = lax.conv_general_dilated(
        h, p["wd"].reshape(Cmid, 1, 3, 3), (1, 1), "SAME",
        dimension_numbers=dn, feature_group_count=Cmid) + p["bd"].reshape(1, Cmid, 1, 1)
    hd = jnp.clip(hd, 0.0, 6.0)
    y = lax.conv_general_dilated(
        hd, p["w2"].reshape(C, Cmid, 1, 1), (1, 1), "SAME",
        dimension_numbers=dn) + p["b2"].reshape(1, C, 1, 1)
    return y + x


if __name__ == "__main__":
    key = jax.random.PRNGKey(0)
    kx, kp = jax.random.split(key)
    N, C, H, W = 2, 4, 16, 16          # NCHW, matches torch input (2, 4, 16, 16)
    EXPAND = 6
    Cmid = C * EXPAND

    x = jax.random.normal(kx, (N, C, H, W), jnp.float32)
    params = make_params(kp, C, Cmid)

    out = jax.block_until_ready(mobile_inverted_residual_block(x, params))
    ref = jax.block_until_ready(reference(x, params))

    assert out.shape == (N, C, H, W)
    err = float(jnp.max(jnp.abs(out - ref)))
    assert jnp.allclose(out, ref, atol=1e-2, rtol=1e-2), err
    print("KERNEL_OK")
</pallas_src>

<mosaic_0001>
module attributes {stable_mosaic.version = 11 : i64} {
  func.func @_mbconv_kernel(%arg0: i32, %arg1: memref<1x4x256xf32, #tpu.memory_space<vmem>>, %arg2: memref<24x4xf32, #tpu.memory_space<vmem>>, %arg3: memref<24x1xf32, #tpu.memory_space<vmem>>, %arg4: memref<24x9xf32, #tpu.memory_space<vmem>>, %arg5: memref<24x1xf32, #tpu.memory_space<vmem>>, %arg6: memref<4x24xf32, #tpu.memory_space<vmem>>, %arg7: memref<4x1xf32, #tpu.memory_space<vmem>>, %arg8: memref<9x256xf32, #tpu.memory_space<vmem>>, %arg9: memref<1x4x256xf32, #tpu.memory_space<vmem>>) attributes {dimension_semantics = [#tpu.dimension_semantics<parallel>], iteration_bounds = array<i64: 2>, scalar_prefetch = 0 : i64, scratch_operands = 0 : i64, tpu.core_type = #tpu.core_type<tc>, window_params = [{transform_indices = @transform_0, window_bounds = array<i64: 1, 4, 256>}, {pipeline_mode = #tpu.pipeline_mode<synchronous>, transform_indices = @transform_1, window_bounds = array<i64: 24, 4>}, {pipeline_mode = #tpu.pipeline_mode<synchronous>, transform_indices = @transform_2, window_bounds = array<i64: 24, 1>}, {pipeline_mode = #tpu.pipeline_mode<synchronous>, transform_indices = @transform_3, window_bounds = array<i64: 24, 9>}, {pipeline_mode = #tpu.pipeline_mode<synchronous>, transform_indices = @transform_4, window_bounds = array<i64: 24, 1>}, {pipeline_mode = #tpu.pipeline_mode<synchronous>, transform_indices = @transform_5, window_bounds = array<i64: 4, 24>}, {pipeline_mode = #tpu.pipeline_mode<synchronous>, transform_indices = @transform_6, window_bounds = array<i64: 4, 1>}, {pipeline_mode = #tpu.pipeline_mode<synchronous>, transform_indices = @transform_7, window_bounds = array<i64: 9, 256>}, {transform_indices = @transform_8, window_bounds = array<i64: 1, 4, 256>}]} {
    %c0 = arith.constant 0 : index
    %c0_0 = arith.constant 0 : index
    %c0_1 = arith.constant 0 : index
    %0 = vector.load %arg1[%c0, %c0_0, %c0_1] : memref<1x4x256xf32, #tpu.memory_space<vmem>>, vector<1x4x256xf32>
    %1 = vector.shape_cast %0 : vector<1x4x256xf32> to vector<4x256xf32>
    %c0_2 = arith.constant 0 : index
    %c0_3 = arith.constant 0 : index
    %2 = vector.load %arg2[%c0_2, %c0_3] : memref<24x4xf32, #tpu.memory_space<vmem>>, vector<24x4xf32>
    %cst = arith.constant dense<0.000000e+00> : vector<24x256xf32>
    %3 = tpu.matmul %2, %1, %cst {dimension_numbers = #tpu.dot_dimension_numbers<[1], [0], [0], [1], [0, 0, 1, 1], [], []>} : vector<24x4xf32>, vector<4x256xf32>, vector<24x256xf32> -> vector<24x256xf32>
    %c0_4 = arith.constant 0 : index
    %c0_5 = arith.constant 0 : index
    %4 = vector.load %arg3[%c0_4, %c0_5] : memref<24x1xf32, #tpu.memory_space<vmem>>, vector<24x1xf32>
    %5 = vector.broadcast %4 : vector<24x1xf32> to vector<24x256xf32>
    %6 = arith.addf %3, %5 : vector<24x256xf32>
    %cst_6 = arith.constant 0.000000e+00 : f32
    %cst_7 = arith.constant 6.000000e+00 : f32
    %7 = vector.broadcast %cst_6 : f32 to vector<24x256xf32>
    %8 = arith.maximumf %7, %6 : vector<24x256xf32>
    %9 = vector.broadcast %cst_7 : f32 to vector<24x256xf32>
    %10 = arith.minimumf %9, %8 : vector<24x256xf32>
    %c0_8 = arith.constant 0 : index
    %c0_9 = arith.constant 0 : index
    %11 = vector.load %arg4[%c0_8, %c0_9] : memref<24x9xf32, #tpu.memory_space<vmem>>, vector<24x9xf32>
    %cst_10 = arith.constant 0.000000e+00 : f32
    %12 = vector.broadcast %cst_10 : f32 to vector<24x256xf32>
    %c17_i32 = arith.constant 17 : i32
    %13 = tpu.dynamic_rotate %10 by %c17_i32 dim 1 : vector<24x256xf32>, i32 -> vector<24x256xf32>
    %c0_11 = arith.constant 0 : index
    %c0_12 = arith.constant 0 : index
    %14 = vector.load %arg8[%c0_11, %c0_12] : memref<9x256xf32, #tpu.memory_space<vmem>>, vector<1x256xf32>
    %15 = vector.broadcast %14 : vector<1x256xf32> to vector<24x256xf32>
    %16 = arith.mulf %13, %15 : vector<24x256xf32>
    %17 = vector.extract_strided_slice %11 {offsets = [0, 0], sizes = [24, 1], strides = [1, 1]} : vector<24x9xf32> to vector<24x1xf32>
    %18 = vector.broadcast %17 : vector<24x1xf32> to vector<24x256xf32>
    %19 = arith.mulf %16, %18 : vector<24x256xf32>
    %20 = arith.addf %12, %19 : vector<24x256xf32>
    %c16_i32 = arith.constant 16 : i32
    %21 = tpu.dynamic_rotate %10 by %c16_i32 dim 1 : vector<24x256xf32>, i32 -> vector<24x256xf32>
    %c1 = arith.constant 1 : index
    %c0_13 = arith.constant 0 : index
    %22 = vector.load %arg8[%c1, %c0_13] : memref<9x256xf32, #tpu.memory_space<vmem>>, vector<1x256xf32>
    %23 = vector.broadcast %22 : vector<1x256xf32> to vector<24x256xf32>
    %24 = arith.mulf %21, %23 : vector<24x256xf32>
    %25 = vector.extract_strided_slice %11 {offsets = [0, 1], sizes = [24, 1], strides = [1, 1]} : vector<24x9xf32> to vector<24x1xf32>
    %26 = vector.broadcast %25 : vector<24x1xf32> to vector<24x256xf32>
    %27 = arith.mulf %24, %26 : vector<24x256xf32>
    %28 = arith.addf %20, %27 : vector<24x256xf32>
    %c15_i32 = arith.constant 15 : i32
    %29 = tpu.dynamic_rotate %10 by %c15_i32 dim 1 : vector<24x256xf32>, i32 -> vector<24x256xf32>
    %c2 = arith.constant 2 : index
    %c0_14 = arith.constant 0 : index
    %30 = vector.load %arg8[%c2, %c0_14] : memref<9x256xf32, #tpu.memory_space<vmem>>, vector<1x256xf32>
    %31 = vector.broadcast %30 : vector<1x256xf32> to vector<24x256xf32>
    %32 = arith.mulf %29, %31 : vector<24x256xf32>
    %33 = vector.extract_strided_slice %11 {offsets = [0, 2], sizes = [24, 1], strides = [1, 1]} : vector<24x9xf32> to vector<24x1xf32>
    %34 = vector.broadcast %33 : vector<24x1xf32> to vector<24x256xf32>
    %35 = arith.mulf %32, %34 : vector<24x256xf32>
    %36 = arith.addf %28, %35 : vector<24x256xf32>
    %c1_i32 = arith.constant 1 : i32
    %37 = tpu.dynamic_rotate %10 by %c1_i32 dim 1 : vector<24x256xf32>, i32 -> vector<24x256xf32>
    %c3 = arith.constant 3 : index
    %c0_15 = arith.constant 0 : index
    %38 = vector.load %arg8[%c3, %c0_15] : memref<9x256xf32, #tpu.memory_space<vmem>>, vector<1x256xf32>
    %39 = vector.broadcast %38 : vector<1x256xf32> to vector<24x256xf32>
    %40 = arith.mulf %37, %39 : vector<24x256xf32>
    %41 = vector.extract_strided_slice %11 {offsets = [0, 3], sizes = [24, 1], strides = [1, 1]} : vector<24x9xf32> to vector<24x1xf32>
    %42 = vector.broadcast %41 : vector<24x1xf32> to vector<24x256xf32>
    %43 = arith.mulf %40, %42 : vector<24x256xf32>
    %44 = arith.addf %36, %43 : vector<24x256xf32>
    %c4 = arith.constant 4 : index
    %c0_16 = arith.constant 0 : index
    %45 = vector.load %arg8[%c4, %c0_16] : memref<9x256xf32, #tpu.memory_space<vmem>>, vector<1x256xf32>
    %46 = vector.broadcast %45 : vector<1x256xf32> to vector<24x256xf32>
    %47 = arith.mulf %10, %46 : vector<24x256xf32>
    %48 = vector.extract_strided_slice %11 {offsets = [0, 4], sizes = [24, 1], strides = [1, 1]} : vector<24x9xf32> to vector<24x1xf32>
    %49 = vector.broadcast %48 : vector<24x1xf32> to vector<24x256xf32>
    %50 = arith.mulf %47, %49 : vector<24x256xf32>
    %51 = arith.addf %44, %50 : vector<24x256xf32>
    %c255_i32 = arith.constant 255 : i32
    %52 = tpu.dynamic_rotate %10 by %c255_i32 dim 1 : vector<24x256xf32>, i32 -> vector<24x256xf32>
    %c5 = arith.constant 5 : index
    %c0_17 = arith.constant 0 : index
    %53 = vector.load %arg8[%c5, %c0_17] : memref<9x256xf32, #tpu.memory_space<vmem>>, vector<1x256xf32>
    %54 = vector.broadcast %53 : vector<1x256xf32> to vector<24x256xf32>
    %55 = arith.mulf %52, %54 : vector<24x256xf32>
    %56 = vector.extract_strided_slice %11 {offsets = [0, 5], sizes = [24, 1], strides = [1, 1]} : vector<24x9xf32> to vector<24x1xf32>
    %57 = vector.broadcast %56 : vector<24x1xf32> to vector<24x256xf32>
    %58 = arith.mulf %55, %57 : vector<24x256xf32>
    %59 = arith.addf %51, %58 : vector<24x256xf32>
    %c241_i32 = arith.constant 241 : i32
    %60 = tpu.dynamic_rotate %10 by %c241_i32 dim 1 : vector<24x256xf32>, i32 -> vector<24x256xf32>
    %c6 = arith.constant 6 : index
    %c0_18 = arith.constant 0 : index
    %61 = vector.load %arg8[%c6, %c0_18] : memref<9x256xf32, #tpu.memory_space<vmem>>, vector<1x256xf32>
    %62 = vector.broadcast %61 : vector<1x256xf32> to vector<24x256xf32>
    %63 = arith.mulf %60, %62 : vector<24x256xf32>
    %64 = vector.extract_strided_slice %11 {offsets = [0, 6], sizes = [24, 1], strides = [1, 1]} : vector<24x9xf32> to vector<24x1xf32>
    %65 = vector.broadcast %64 : vector<24x1xf32> to vector<24x256xf32>
    %66 = arith.mulf %63, %65 : vector<24x256xf32>
    %67 = arith.addf %59, %66 : vector<24x256xf32>
    %c240_i32 = arith.constant 240 : i32
    %68 = tpu.dynamic_rotate %10 by %c240_i32 dim 1 : vector<24x256xf32>, i32 -> vector<24x256xf32>
    %c7 = arith.constant 7 : index
    %c0_19 = arith.constant 0 : index
    %69 = vector.load %arg8[%c7, %c0_19] : memref<9x256xf32, #tpu.memory_space<vmem>>, vector<1x256xf32>
    %70 = vector.broadcast %69 : vector<1x256xf32> to vector<24x256xf32>
    %71 = arith.mulf %68, %70 : vector<24x256xf32>
    %72 = vector.extract_strided_slice %11 {offsets = [0, 7], sizes = [24, 1], strides = [1, 1]} : vector<24x9xf32> to vector<24x1xf32>
    %73 = vector.broadcast %72 : vector<24x1xf32> to vector<24x256xf32>
    %74 = arith.mulf %71, %73 : vector<24x256xf32>
    %75 = arith.addf %67, %74 : vector<24x256xf32>
    %c239_i32 = arith.constant 239 : i32
    %76 = tpu.dynamic_rotate %10 by %c239_i32 dim 1 : vector<24x256xf32>, i32 -> vector<24x256xf32>
    %c8 = arith.constant 8 : index
    %c0_20 = arith.constant 0 : index
    %77 = vector.load %arg8[%c8, %c0_20] : memref<9x256xf32, #tpu.memory_space<vmem>>, vector<1x256xf32>
    %78 = vector.broadcast %77 : vector<1x256xf32> to vector<24x256xf32>
    %79 = arith.mulf %76, %78 : vector<24x256xf32>
    %80 = vector.extract_strided_slice %11 {offsets = [0, 8], sizes = [24, 1], strides = [1, 1]} : vector<24x9xf32> to vector<24x1xf32>
    %81 = vector.broadcast %80 : vector<24x1xf32> to vector<24x256xf32>
    %82 = arith.mulf %79, %81 : vector<24x256xf32>
    %83 = arith.addf %75, %82 : vector<24x256xf32>
    %c0_21 = arith.constant 0 : index
    %c0_22 = arith.constant 0 : index
    %84 = vector.load %arg5[%c0_21, %c0_22] : memref<24x1xf32, #tpu.memory_space<vmem>>, vector<24x1xf32>
    %85 = vector.broadcast %84 : vector<24x1xf32> to vector<24x256xf32>
    %86 = arith.addf %83, %85 : vector<24x256xf32>
    %cst_23 = arith.constant 0.000000e+00 : f32
    %cst_24 = arith.constant 6.000000e+00 : f32
    %87 = vector.broadcast %cst_23 : f32 to vector<24x256xf32>
    %88 = arith.maximumf %87, %86 : vector<24x256xf32>
    %89 = vector.broadcast %cst_24 : f32 to vector<24x256xf32>
    %90 = arith.minimumf %89, %88 : vector<24x256xf32>
    %c0_25 = arith.constant 0 : index
    %c0_26 = arith.constant 0 : index
    %91 = vector.load %arg6[%c0_25, %c0_26] : memref<4x24xf32, #tpu.memory_space<vmem>>, vector<4x24xf32>
    %cst_27 = arith.constant dense<0.000000e+00> : vector<4x256xf32>
    %92 = tpu.matmul %91, %90, %cst_27 {dimension_numbers = #tpu.dot_dimension_numbers<[1], [0], [0], [1], [0, 0, 1, 1], [], []>} : vector<4x24xf32>, vector<24x256xf32>, vector<4x256xf32> -> vector<4x256xf32>
    %c0_28 = arith.constant 0 : index
    %c0_29 = arith.constant 0 : index
    %93 = vector.load %arg7[%c0_28, %c0_29] : memref<4x1xf32, #tpu.memory_space<vmem>>, vector<4x1xf32>
    %94 = vector.broadcast %93 : vector<4x1xf32> to vector<4x256xf32>
    %95 = arith.addf %92, %94 : vector<4x256xf32>
    %96 = arith.addf %95, %1 : vector<4x256xf32>
    %c0_30 = arith.constant 0 : index
    %c0_31 = arith.constant 0 : index
    %c0_32 = arith.constant 0 : index
    %97 = vector.load %arg9[%c0_30, %c0_31, %c0_32] : memref<1x4x256xf32, #tpu.memory_space<vmem>>, vector<1x4x256xf32>
    %98 = vector.shape_cast %97 : vector<1x4x256xf32> to vector<4x256xf32>
    %99 = vector.shape_cast %96 : vector<4x256xf32> to vector<1x4x256xf32>
    tpu.vector_store %arg9[%c0_30, %c0_31, %c0_32], %99 {strides = array<i32>} : memref<1x4x256xf32, #tpu.memory_space<vmem>>, vector<1x4x256xf32>,
    return
  }
  func.func @transform_0(%arg0: i32) -> (i32, i32, i32) {
    %c0_i32 = arith.constant 0 : i32
    %c0_i32_0 = arith.constant 0 : i32
    %c0_i32_1 = arith.constant 0 : i32
    return %arg0, %c0_i32, %c0_i32_0 : i32, i32, i32
  }
  func.func @transform_1(%arg0: i32) -> (i32, i32) {
    %c0_i32 = arith.constant 0 : i32
    %c0_i32_0 = arith.constant 0 : i32
    %c0_i32_1 = arith.constant 0 : i32
    return %c0_i32, %c0_i32_0 : i32, i32
  }
  func.func @transform_2(%arg0: i32) -> (i32, i32) {
    %c0_i32 = arith.constant 0 : i32
    %c0_i32_0 = arith.constant 0 : i32
    %c0_i32_1 = arith.constant 0 : i32
    return %c0_i32, %c0_i32_0 : i32, i32
  }
  func.func @transform_3(%arg0: i32) -> (i32, i32) {
    %c0_i32 = arith.constant 0 : i32
    %c0_i32_0 = arith.constant 0 : i32
    %c0_i32_1 = arith.constant 0 : i32
    return %c0_i32, %c0_i32_0 : i32, i32
  }
  func.func @transform_4(%arg0: i32) -> (i32, i32) {
    %c0_i32 = arith.constant 0 : i32
    %c0_i32_0 = arith.constant 0 : i32
    %c0_i32_1 = arith.constant 0 : i32
    return %c0_i32, %c0_i32_0 : i32, i32
  }
  func.func @transform_5(%arg0: i32) -> (i32, i32) {
    %c0_i32 = arith.constant 0 : i32
    %c0_i32_0 = arith.constant 0 : i32
    %c0_i32_1 = arith.constant 0 : i32
    return %c0_i32, %c0_i32_0 : i32, i32
  }
  func.func @transform_6(%arg0: i32) -> (i32, i32) {
    %c0_i32 = arith.constant 0 : i32
    %c0_i32_0 = arith.constant 0 : i32
    %c0_i32_1 = arith.constant 0 : i32
    return %c0_i32, %c0_i32_0 : i32, i32
  }
  func.func @transform_7(%arg0: i32) -> (i32, i32) {
    %c0_i32 = arith.constant 0 : i32
    %c0_i32_0 = arith.constant 0 : i32
    %c0_i32_1 = arith.constant 0 : i32
    return %c0_i32, %c0_i32_0 : i32, i32
  }
  func.func @transform_8(%arg0: i32) -> (i32, i32, i32) {
    %c0_i32 = arith.constant 0 : i32
    %c0_i32_0 = arith.constant 0 : i32
    %c0_i32_1 = arith.constant 0 : i32
    return %arg0, %c0_i32, %c0_i32_0 : i32, i32, i32
  }
}

</mosaic_0001>

<bundles_post_ra>
// kernel: tpu_custom_call.1
= control target key start
LH: loop header
LB: loop body
LE: loop exit
PB: predicated region body
PF: predicated region fallthrough
CT: control target
= control target key end

     0   :  { %13 = vsyncpa [#allocation3], 0  ;;  %s2153_s0 = inlined_call_operand.vmem [shape: f32[2,4,256], index: 0, kind: input, shape index: {}]   ;;  %s2154_s1 = inlined_call_operand.vmem [shape: f32[24,4], index: 1, kind: input, shape index: {}]   ;;  %s2155_s2 = inlined_call_operand.vmem [shape: f32[24,1], index: 2, kind: input, shape index: {}]   ;;  %s2156_s3 = inlined_call_operand.vmem [shape: f32[24,9], index: 3, kind: input, shape index: {}]   ;;  %s2157_s4 = inlined_call_operand.vmem [shape: f32[24,1], index: 4, kind: input, shape index: {}]   ;;  %s2158_s5 = inlined_call_operand.vmem [shape: f32[4,24], index: 5, kind: input, shape index: {}]   ;;  %s2159_s6 = inlined_call_operand.vmem [shape: f32[4,1], index: 6, kind: input, shape index: {}]   ;;  %s2160_s7 = inlined_call_operand.vmem [shape: f32[9,256], index: 7, kind: input, shape index: {}]   ;;  %s2161_s8 = inlined_call_operand.hbm [shape: f32[2,4,256], index: 8, kind: output, shape index: {}]  }
   0x1   :  { %15 = vsyncpa [#allocation3 + $0x1], 0  ;;  %s1429_s27 = smov 0   ;;  %s1431_s28 = smov 0  }
   0x2   :  { %s1433_s29 = smov 0   ;;  %s1435_s30 = smov 0  }
   0x3 LB: > { %s1450_s9 = sadd.s32 4294967295, %s1363_s30   ;;  %s1184_s10 = sadd.s32 4294967294, %s1363_s30   ;;  %s1363_s30 = sphi %s1435_s30, %s2209_s30   ;;  %s1359_s29 = sphi %s1433_s29, %s2208_s29   ;;  %s1355_s28 = sphi %s1431_s28, %s2207_s28   ;;  %s1351_s27 = sphi %s1429_s27, %s2206_s27  }
   0x4   : > { %s1454_s11 = sadd.s32 1, %s1363_s30   ;;  %s201_s12 = sadd.s32 1, %s1359_s29 }
   0x5   : > { %s198_s13 = ssub.s32 %s1363_s30, %s1454_s11  ;;  %p211_p0 = scmp.ne.s32.totalorder %s1359_s29, %s1355_s28 }
   0x6   : > { %p199_p1 = scmp.eq.s32.totalorder %s198_s13, 0  ;;  %p212_p2 = scmp.eq.s32.totalorder %s1450_s9, 1 }
   0x7   : > { %p217_p3 = scmp.ne.s32.totalorder %s1355_s28, %s1351_s27  ;;  %p218_p4 = scmp.eq.s32.totalorder %s1184_s10, 1 }
   0x8   : > { %s1465_s14 = scalar_select %p199_p1, %s1359_s29, %s201_s12  }
   0x9   : > { %p1467_p5 = por %p212_p2, %p211_p0  ;;  %p1471_p6 = por %p218_p4, %p217_p3 }
   0xa   : > { %p1187_p7 = scmp.ge.s32.totalorder %s1363_s30, 1  ;;  %p265_p8 = scmp.lt.s32.totalorder %s1363_s30, 3 }
   0xc   : > { %p266_p9 = pnand %p1187_p7, %p265_p8 }
   0xe   : > { %269 = sbr.rel (%p266_p9) target bundleno = 713 (0x2c9), region = 52 }
  0x15   : > { %p299_p10 = scmp.lt.s32.totalorder %s1450_s9, 1  ;;  %v1365_v0 = vmov 0.0   ;;  %v438_v1 = vld [vmem:[%s2156_s3] sm:$0xff]  ;;  %v1366_v2 = vmov 3   ;;  %v310_v3 = vld [vmem:[%s2155_s2 + $0x10] sm:$0xff]  ;;  %v1367_v4 = vmov 0  }
  0x16   : > { %407 = vmatprep.mubr.f32.mxu0 %v1365_v0  ;;  %1095 = vmatprep.mubr.f32.mxu1 %v1365_v0  ;;  %v1495_v5 = vld [vmem:[%s2156_s3 + $0x8] sm:$0xff]  ;;  %vm338_vm0 = vcmask 1043456   ;;  %v1368_v8 = vmov 1   ;;  %v305_v9 = vld [vmem:[%s2154_s1] sm:$0xff]  ;;  %vm328_vm1 = vcmask 31744   ;;  %v1508_v10 = vld [vmem:[%s2156_s3 + $0x10] sm:$0xff] }
  0x17   : > { %s300_s19 = scalar_select %p299_p10, %s1450_s9, 1  ;;  %1276 = vset.pattern.permute.xlu0 %v1366_v2  ;;  %1273 = vset.pattern.permute.xlu1 %v1367_v4  ;;  %v306_v11 = vld [vmem:[%s2154_s1 + $0x8] sm:$0xff]  ;;  %v307_v12 = vld [vmem:[%s2154_s1 + $0x10] sm:$0xff]  ;;  %v1369_v13 = vmov 4   ;;  %v1370_v14 = vmov 2   ;;  %v1371_v15 = vmov 5  }
  0x18   : > { %670 = vperm.xlu0 %1276, %v438_v1   ;;  %323 = vperm.xlu1 %1273, %v310_v3   ;;  %v1372_v16 = vmov 6   ;;  %v1373_v17 = vmov 8   ;;  %v1374_v18 = vmov 7   ;;  %v308_v19 = vld [vmem:[%s2155_s2] sm:$0xff]  ;;  %v309_v20 = vld [vmem:[%s2155_s2 + $0x8] sm:$0xff]  ;;  %s1376_s20 = smov 17  }
  0x19   : > { %s1210_s22 = sshll.u32 %s300_s19, 3  ;;  %v984_v21 = vld [vmem:[%s2157_s4] sm:$0xff]  ;;  %v985_v22 = vld [vmem:[%s2157_s4 + $0x8] sm:$0xff]  ;;  %s1375_s19 = smov 15   ;;  %vm1027_vm10 = vcmask 195584  }
  0x1a   : > { %s1490_s25 = scalar_lea.vmem %s2153_s0, %s1210_s22  ;;  %s1377_s21 = smov 111  }
  0x1b   : > { %v304_v6 = vld [vmem:[%s1490_s25] sm:$0xff]  ;;  %s1378_s22 = smov 16   ;;  %s1379_s23 = smov 1  }
  0x1c   : > { %v1498_v7 = vcombine.high %v304_v6, %v304_v6  ;;  %1277 = vset.pattern.permute.xlu0 %v1368_v8  ;;  %482 = vperm.xlu1 %1273, %v438_v1   ;;  %s1380_s24 = smov 127   ;;  %s1381_s26 = smov 113  }
  0x1d   : > { %550 = vperm.xlu0 %1277, %v1495_v5   ;;  %s1382_s10 = smov 112   ;;  %s296_s12 = sand.u32 1, %s1355_s28  }
  0x1e   : > { %2178 = vst [vmem:[#allocation5_spill] sm:$0xff] %v1498_v7  ;;  %1191 = vmatprep.subr.msk.mxu0 %vm338_vm0, %v1498_v7  ;;  %s1188_s13 = sshll.u32 %s296_s12, 3  ;;  %s1211_s17 = sshll.u32 %s1450_s9, 7 }
  0x1f   : > { %1192 = vmatpush1.msk.msra.mxu0 %vm338_vm0, %v304_v6  ;;  %s298_s18 = scalar_lea.vmem [#allocation2], %s1188_s13  ;;  %s1383_s9 = smov [#allocation2]  }
  0x20   : > { %1193 = vmatmul.mubr.msk.f32.vlgmr.msra.gmra.mrb[0].mxu0 %vm328_vm1, %v305_v9  ;;  %1274 = vset.pattern.permute.xlu1 %v1368_v8 }
  0x21   : > { %413 = vmatprep.mubr.f32.mxu0 %v1365_v0  ;;  %554 = vperm.xlu0 %1277, %v1508_v10  }
  0x22   : > { %546 = vperm.xlu1 %1274, %v438_v1  }
  0x24   : > { %1194 = vmatmul.mubr.msk.f32.gmra.mrb[2].mxu0 %vm328_vm1, %v306_v11 }
  0x25   : > { %419 = vmatprep.mubr.f32.mxu0 %v1365_v0  ;;  %1280 = vset.pattern.permute.xlu0 %v1369_v13 }
  0x26   : > { %713 = vperm.xlu0 %1280, %v438_v1   ;;  %1275 = vset.pattern.permute.xlu1 %v1370_v14 }
  0x27   : > { %608 = vperm.xlu1 %1275, %v438_v1  }
  0x28   : > { %1195 = vmatmul.mubr.msk.f32.gmra.mrb[4].mxu0 %vm328_vm1, %v307_v12 }
  0x2a   : > { %1283 = vset.pattern.permute.xlu0 %v1371_v15 }
  0x2b   : > { %775 = vperm.xlu0 %1283, %v438_v1   ;;  %612 = vperm.xlu1 %1275, %v1495_v5  }
  0x2f   : > { %1286 = vset.pattern.permute.xlu0 %v1372_v16  ;;  %1278 = vset.pattern.permute.xlu1 %v1366_v2 }
  0x30   : > { %837 = vperm.xlu0 %1286, %v438_v1   ;;  %674 = vperm.xlu1 %1278, %v1495_v5  }
  0x34   : > { %1291 = vset.pattern.permute.xlu0 %v1373_v17  ;;  %1279 = vset.pattern.permute.xlu1 %v1367_v4 }
  0x35   : > { %961 = vperm.xlu0 %1291, %v438_v1   ;;  %492 = vperm.xlu1 %1279, %v1508_v10  }
  0x39   : > { %1292 = vset.pattern.permute.xlu0 %v1374_v18  ;;  %1281 = vset.pattern.permute.xlu1 %v1369_v13 }
  0x3a   : > { %899 = vperm.xlu0 %1292, %v438_v1   ;;  %717 = vperm.xlu1 %1281, %v1495_v5  }
  0x3e   : > { %907 = vperm.xlu0 %1292, %v1508_v10   ;;  %1282 = vset.pattern.permute.xlu1 %v1370_v14  ;;  %v1021_v14 = vld [vmem:[%s2159_s6] sm:$0xf] }
  0x3f   : > { %616 = vperm.xlu1 %1282, %v1508_v10  }
  0x42   : > { %1295 = vset.pattern.permute.xlu0 %v1367_v4 }
  0x43   : > { %313 = vperm.xlu0 %1295, %v308_v19   ;;  %1284 = vset.pattern.permute.xlu1 %v1371_v15 }
  0x44   : > { %779 = vperm.xlu1 %1284, %v1495_v5  }
  0x47   : > { %318 = vperm.xlu0 %1295, %v309_v20  }
  0x48   : > { %1285 = vset.pattern.permute.xlu1 %v1366_v2 }
  0x49   : > { %678 = vperm.xlu1 %1285, %v1508_v10  }
  0x4b   : > { %487 = vperm.xlu0 %1295, %v1495_v5  }
  0x4d   : > { %1287 = vset.pattern.permute.xlu1 %v1372_v16 }
  0x4e   : > { %841 = vperm.xlu1 %1287, %v1495_v5  }
  0x4f   : > { %989 = vperm.xlu0 %1295, %v984_v21  }
  0x52   : > { %1288 = vset.pattern.permute.xlu1 %v1369_v13 }
  0x53   : > { %721 = vperm.xlu1 %1288, %v1508_v10  }
  0x57   : > { %1289 = vset.pattern.permute.xlu1 %v1374_v18 }
  0x58   : > { %903 = vperm.xlu1 %1289, %v1495_v5  }
  0x5c   : > { %1290 = vset.pattern.permute.xlu1 %v1371_v15 }
  0x5d   : > { %783 = vperm.xlu1 %1290, %v1508_v10  }
  0x61   : > { %1293 = vset.pattern.permute.xlu1 %v1373_v17 }
  0x62   : > { %965 = vperm.xlu1 %1293, %v1495_v5  }
  0x66   : > { %1294 = vset.pattern.permute.xlu1 %v1372_v16 }
  0x67   : > { %845 = vperm.xlu1 %1294, %v1508_v10  }
  0x6b   : > { %1296 = vset.pattern.permute.xlu1 %v1367_v4 }
  0x6c   : > { %994 = vperm.xlu1 %1296, %v985_v22  }
  0x70   : > { %1297 = vset.pattern.permute.xlu1 %v1373_v17 }
  0x71   : > { %969 = vperm.xlu1 %1297, %v1508_v10   ;;  %v986_v10 = vld [vmem:[%s2157_s4 + $0x10] sm:$0xff] }
  0x75   : > { %1298 = vset.pattern.permute.xlu1 %v1367_v4 }
  0x97   : > { %v1554_v23 = vpop.permute.xlu0 %670  ;;  %v324_v45 = vpop.permute.xlu1 %323 }
  0x9b   : > { %v1588_v47 = vpop.permute.xlu1 %482 }
  0x9c   : > { %v1556_v24 = vpop.permute.xlu0 %550 }
  0xa0   : > { %v1558_v25 = vpop.permute.xlu0 %554 }
  0xa1   : > { %2179 = vst [vmem:[#allocation6_spill] sm:$0xff] %v1558_v25  ;;  %v1594_v49 = vpop.permute.xlu1 %546 }
  0xa5   : > { %v1560_v26 = vpop.permute.xlu0 %713 }
  0xa6   : > { %v1604_v51 = vpop.permute.xlu1 %608 }
  0xaa   : > { %v1562_v27 = vpop.permute.xlu0 %775  ;;  %v1612_v53 = vpop.permute.xlu1 %612 }
  0xaf   : > { %v1564_v28 = vpop.permute.xlu0 %837  ;;  %v1622_v55 = vpop.permute.xlu1 %674 }
  0xb4   : > { %v1566_v29 = vpop.permute.xlu0 %961  ;;  %v1630_v58 = vpop.permute.xlu1 %492 }
  0xb5   : > { %2181 = vst [vmem:[#allocation8_spill] sm:$0xff] %v1630_v58 }
  0xb9   : > { %v1568_v30 = vpop.permute.xlu0 %899  ;;  %v1640_v59 = vpop.permute.xlu1 %717 }
  0xbd   : > { %v1570_v31 = vpop.permute.xlu0 %907 }
  0xbe   : > { %2180 = vst [vmem:[#allocation7_spill] sm:$0xff] %v1570_v31  ;;  %v1646_v61 = vpop.permute.xlu1 %616 }
  0xbf   : > { %2182 = vst [vmem:[#allocation9_spill] sm:$0xff] %v1646_v61 }
  0xc2   : > { %v314_v32 = vpop.permute.xlu0 %313 }
  0xc3   : > { %v1654_v1 = vpop.permute.xlu1 %779 }
  0xc6   : > { %v319_v37 = vpop.permute.xlu0 %318 }
  0xc8   : > { %v1664_v3 = vpop.permute.xlu1 %678 }
  0xc9   : > { %2184 = vst [vmem:[#allocation11_spill] sm:$0xff] %v1664_v3 }
  0xca   : > { %v1720_v15 = vpop.permute.xlu0 %487 }
  0xcd   : > { %v1672_v5 = vpop.permute.xlu1 %841 }
  0xce   : > { %v1724_v17 = vpop.permute.xlu0 %989 }
  0xd2   : > { %v1682_v6 = vpop.permute.xlu1 %721 }
  0xd3   : > { %2186 = vst [vmem:[#allocation13_spill] sm:$0xff] %v1682_v6 }
  0xd7   : > { %v1688_v8 = vpop.permute.xlu1 %903 }
  0xdc   : > { %v1698_v9 = vpop.permute.xlu1 %783 }
  0xdd   : > { %2187 = vst [vmem:[#allocation14_spill] sm:$0xff] %v1698_v9 }
  0xe1   : > { %v1705_v11 = vpop.permute.xlu1 %965 }
  0xe2   : > { %2188 = vst [vmem:[#allocation15_spill] sm:$0xff] %v1705_v11 }
  0xe6   : > { %v1711_v12 = vpop.permute.xlu1 %845 }
  0xe7   : > { %2189 = vst [vmem:[#allocation16_spill] sm:$0xff] %v1711_v12 }
  0xeb   : > { %v1715_v13 = vpop.permute.xlu1 %994 }
  0xec   : > { %2190 = vst [vmem:[#allocation17_spill] sm:$0xff] %v1715_v13 }
  0xf0   : > { %v1722_v16 = vpop.permute.xlu1 %969 }
  0xf1   : > { %2191 = vst [vmem:[#allocation18_spill] sm:$0xff] %v1722_v16 }
  0xf3   : > { %v409_v33 = vpop.f32.mrb[0].mxu0 }
  0xf4   : > { %v410_v34 = vadd.f32 %v409_v33, %v314_v32  ;;  %v411_v35 = vpop.f32.mrb[1].mxu0 }
  0xf5   : > { %v412_v48 = vadd.f32 %v411_v35, %v314_v32  ;;  %v453_v35 = vlaneseq }
  0xf6   : > { %v426_v36 = vmax.f32 %v410_v34, 0.0 }
  0xf7   : > { %v415_v38 = vpop.f32.mrb[2].mxu0  ;;  %v427_v50 = vmax.f32 %v412_v48, 0.0  ;;  %v1199_v48 = vld [vmem:[%s2160_s7 + $0x4] ss:$8 sm:$0x3] }
  0xf8   : > { %v1572_v39 = vmin.f32 %v426_v36, 6.0  ;;  %v416_v40 = vadd.f32 %v415_v38, %v319_v37  ;;  %v417_v41 = vpop.f32.mrb[3].mxu0  ;;  %v465_v38 = vshrl.u32 %v453_v35, 7 }
  0xf9   : > { %v1606_v52 = vmin.f32 %v427_v50, 6.0  ;;  %v418_v54 = vadd.f32 %v417_v41, %v319_v37 }
  0xfa   : > { %569 = vrot.lane.b32.xlu1 %v1572_v39, %s1375_s19  ;;  %441 = vrot.lane.b32.xlu0 %v1572_v39, %s1376_s20  ;;  %v428_v43 = vmax.f32 %v416_v40, 0.0 }
  0xfb   : > { %v421_v42 = vpop.f32.mrb[4].mxu0  ;;  %v429_v56 = vmax.f32 %v418_v54, 0.0 }
  0xfc   : > { %v423_v44 = vpop.f32.mrb[5].mxu0  ;;  %v1582_v46 = vmin.f32 %v428_v43, 6.0  ;;  %v422_v60 = vadd.f32 %v421_v42, %v324_v45  ;;  %v1744_v42 = vand.u32 127, %v453_v35  ;;  %v1746_v43 = vsub.s32 0, %v465_v38 }
  0xfd   : > { %v1628_v57 = vmin.f32 %v429_v56, 6.0  ;;  %v424_v0 = vadd.f32 %v423_v44, %v324_v45  ;;  %v1748_v44 = vsub.s32 1, %v465_v38  ;;  %v1196_v45 = vld [vmem:[%s2160_s7 + $0x1] ss:$8 sm:$0x3] }
  0xfe   : > { %922 = vrot.lane.b32.xlu1 %v1572_v39, %s1377_s21  ;;  %507 = vrot.lane.b32.xlu0 %v1572_v39, %s1378_s22  ;;  %v430_v62 = vmax.f32 %v422_v60, 0.0  ;;  %v462_v56 = vld [vmem:[%s2160_s7] ss:$8 sm:$0x3]  ;;  %vm455_vm2 = vcmp.lt.s32.totalorder %v1744_v42, 17  ;;  %vm519_vm3 = vcmp.lt.s32.totalorder %v1744_v42, 16  ;;  %v1764_v60 = vrot.slane %v1196_v45, %v1746_v43 }
  0xff   : > { %v431_v2 = vmax.f32 %v424_v0, 0.0  ;;  %v1770_v0 = vrot.slane %v1199_v48, %v1746_v43  ;;  %v1782_v35 = vrot.slane %v462_v56, %v1748_v44  ;;  %vm581_vm4 = vcmp.lt.s32.totalorder %v1744_v42, 15 }
 0x100   : > { %v1652_v63 = vmin.f32 %v430_v62, 6.0  ;;  %v1767_v62 = vrot.slane %v1196_v45, %v1748_v44  ;;  %vm643_vm5 = vcmp.lt.s32.totalorder %v1744_v42, 1  ;;  %vm748_vm6 = vcmp.lt.s32.totalorder %v1744_v42, 127 }
 0x101   : > { %v1666_v4 = vmin.f32 %v431_v2, 6.0  ;;  %v1773_v2 = vrot.slane %v1199_v48, %v1748_v44  ;;  %vm810_vm7 = vcmp.lt.s32.totalorder %v1744_v42, 113  ;;  %vm872_vm8 = vcmp.lt.s32.totalorder %v1744_v42, 112 }
 0x102   : > { %443 = vrot.lane.b32.xlu1 %v1582_v46, %s1376_s20  ;;  %631 = vrot.lane.b32.xlu0 %v1572_v39, %s1379_s23  ;;  %2183 = vst [vmem:[#allocation10_spill] sm:$0xff] %v1652_v63  ;;  %vm934_vm9 = vcmp.lt.s32.totalorder %v1744_v42, 111 }
 0x103   : > { %2185 = vst [vmem:[#allocation12_spill] sm:$0xff] %v1666_v4 }
 0x106   : > { %509 = vrot.lane.b32.xlu1 %v1582_v46, %s1378_s22  ;;  %736 = vrot.lane.b32.xlu0 %v1572_v39, %s1380_s24 }
 0x10a   : > { %571 = vrot.lane.b32.xlu1 %v1582_v46, %s1375_s19  ;;  %798 = vrot.lane.b32.xlu0 %v1572_v39, %s1381_s26 }
 0x10e   : > { %633 = vrot.lane.b32.xlu1 %v1582_v46, %s1379_s23  ;;  %860 = vrot.lane.b32.xlu0 %v1572_v39, %s1382_s10 }
 0x112   : > { %738 = vrot.lane.b32.xlu1 %v1582_v46, %s1380_s24  ;;  %447 = vrot.lane.b32.xlu0 %v1606_v52, %s1376_s20 }
 0x116   : > { %800 = vrot.lane.b32.xlu1 %v1582_v46, %s1381_s26  ;;  %513 = vrot.lane.b32.xlu0 %v1606_v52, %s1378_s22 }
 0x11a   : > { %862 = vrot.lane.b32.xlu1 %v1582_v46, %s1382_s10  ;;  %575 = vrot.lane.b32.xlu0 %v1606_v52, %s1375_s19 }
 0x11e   : > { %924 = vrot.lane.b32.xlu1 %v1582_v46, %s1377_s21  ;;  %637 = vrot.lane.b32.xlu0 %v1606_v52, %s1379_s23 }
 0x122   : > { %449 = vrot.lane.b32.xlu1 %v1628_v57, %s1376_s20  ;;  %742 = vrot.lane.b32.xlu0 %v1606_v52, %s1380_s24 }
 0x126   : > { %515 = vrot.lane.b32.xlu1 %v1628_v57, %s1378_s22  ;;  %804 = vrot.lane.b32.xlu0 %v1606_v52, %s1381_s26 }
 0x12a   : > { %577 = vrot.lane.b32.xlu1 %v1628_v57, %s1375_s19  ;;  %866 = vrot.lane.b32.xlu0 %v1606_v52, %s1382_s10 }
 0x12e   : > { %639 = vrot.lane.b32.xlu1 %v1628_v57, %s1379_s23  ;;  %928 = vrot.lane.b32.xlu0 %v1606_v52, %s1377_s21 }
 0x132   : > { %744 = vrot.lane.b32.xlu1 %v1628_v57, %s1380_s24  ;;  %740 = vrot.lane.b32.xlu0 %v1652_v63, %s1380_s24 }
 0x136   : > { %806 = vrot.lane.b32.xlu1 %v1628_v57, %s1381_s26  ;;  %864 = vrot.lane.b32.xlu0 %v1652_v63, %s1382_s10 }
 0x13a   : > { %868 = vrot.lane.b32.xlu1 %v1628_v57, %s1382_s10  ;;  %451 = vrot.lane.b32.xlu0 %v1666_v4, %s1376_s20 }
 0x13e   : > { %930 = vrot.lane.b32.xlu1 %v1628_v57, %s1377_s21  ;;  %517 = vrot.lane.b32.xlu0 %v1666_v4, %s1378_s22 }
 0x142   : > { %445 = vrot.lane.b32.xlu1 %v1652_v63, %s1376_s20  ;;  %579 = vrot.lane.b32.xlu0 %v1666_v4, %s1375_s19 }
 0x146   : > { %511 = vrot.lane.b32.xlu1 %v1652_v63, %s1378_s22  ;;  %641 = vrot.lane.b32.xlu0 %v1666_v4, %s1379_s23  ;;  %s2111_s22 = scalar_lea.hbm %s2161_s8, %s1211_s17 }
 0x14a   : > { %573 = vrot.lane.b32.xlu1 %v1652_v63, %s1375_s19  ;;  %926 = vrot.lane.b32.xlu0 %v1652_v63, %s1377_s21  ;;  %s1125_s19 = sshll.u32 %s298_s18, 4  ;;  %s2113_s19 = int_to_ptr.vmem [resolvable:$true] %s1125_s19 }
 0x14e   : > { %635 = vrot.lane.b32.xlu1 %v1652_v63, %s1379_s23  ;;  %808 = vrot.lane.b32.xlu0 %v1666_v4, %s1381_s26  ;;  %s1111_s23 = scalar_lea.sflag [#allocation3], %s296_s12 }
 0x152   : > { %802 = vrot.lane.b32.xlu1 %v1652_v63, %s1381_s26  ;;  %999 = vperm.xlu0 %1295, %v986_v10   ;;  %v1197_v10 = vld [vmem:[%s2160_s7 + $0x2] ss:$8 sm:$0x3] }
 0x153   : > { %v1798_v9 = vrot.slane %v1197_v10, %v1746_v43  ;;  %v1801_v6 = vrot.slane %v1197_v10, %v1748_v44 }
 0x156   : > { %746 = vrot.lane.b32.xlu1 %v1666_v4, %s1380_s24  ;;  %s1305_s24 = sshll.u32 %s1383_s9, 4  ;;  %s1306_s24 = int_to_ptr.vmem [resolvable:$false] %s1305_s24 }
 0x157   : > { %s1307_s26 = scalar_lea.vmem %s1306_s24, 256  ;;  %p1308_p0 = scmp.lt.s32.totalorder %s2113_s19, %s1306_s24 }
 0x15a   : > { %870 = vrot.lane.b32.xlu1 %v1666_v4, %s1382_s10 }
 0x15e   : > { %932 = vrot.lane.b32.xlu1 %v1666_v4, %s1377_s21 }
 0x162   : > { %1024 = vperm.xlu1 %1298, %v1021_v14   ;;  %v1779_v14 = vrot.slane %v462_v56, %v1746_v43 }
 0x16c   : > { %v570_v18 = vpop.permute.xlu1 %569  ;;  %v442_v19 = vpop.permute.xlu0 %441 }
 0x170   : > { %v1726_v20 = vpop.permute.xlu1 %922  ;;  %v508_v21 = vpop.permute.xlu0 %507 }
 0x174   : > { %v1728_v22 = vpop.permute.xlu1 %443  ;;  %v1730_v32 = vpop.permute.xlu0 %631 }
 0x178   : > { %v1732_v33 = vpop.permute.xlu1 %509  ;;  %v1734_v34 = vpop.permute.xlu0 %736 }
 0x17c   : > { %v1736_v36 = vpop.permute.xlu1 %571  ;;  %v1738_v37 = vpop.permute.xlu0 %798 }
 0x180   : > { %v1740_v40 = vpop.permute.xlu1 %633  ;;  %v1742_v41 = vpop.permute.xlu0 %860 }
 0x184   : > { %v1756_v50 = vpop.permute.xlu1 %738  ;;  %v448_v54 = vpop.permute.xlu0 %447 }
 0x185   : > { %v456_v7 = vsel %vm455_vm2, %v442_v19, %v448_v54  ;;  %v459_v48 = vsel %vm455_vm2, %v448_v54, %v442_v19  ;;  %v1198_v19 = vld [vmem:[%s2160_s7 + $0x3] ss:$8 sm:$0x3]  ;;  %v707_v54 = vmul.f32 %v1773_v2, %v1606_v52 }
 0x186   : > { %v1820_v52 = vrot.slane %v1198_v19, %v1746_v43 }
 0x187   : > { %v725_v58 = vmul.f32 %v1560_v26, %v707_v54 }
 0x188   : > { %v1784_v38 = vpop.permute.xlu1 %800  ;;  %v514_v45 = vpop.permute.xlu0 %513 }
 0x189   : > { %v520_v16 = vsel %vm519_vm3, %v508_v21, %v514_v45  ;;  %v523_v31 = vsel %vm519_vm3, %v514_v45, %v508_v21  ;;  %v706_v21 = vmul.f32 %v1770_v0, %v1572_v39  ;;  %v1823_v39 = vrot.slane %v1198_v19, %v1748_v44 }
 0x18a   : > { %v539_v56 = vmul.f32 %v1764_v60, %v523_v31  ;;  %v540_v12 = vmul.f32 %v1767_v62, %v520_v16  ;;  %v474_v31 = vmul.f32 %v1779_v14, %v459_v48  ;;  %v475_v16 = vmul.f32 %v1782_v35, %v456_v7 }
 0x18b   : > { %v724_v25 = vmul.f32 %v1560_v26, %v706_v21 }
 0x18c   : > { %v1812_v45 = vpop.permute.xlu1 %862  ;;  %v576_v4 = vpop.permute.xlu0 %575  ;;  %v557_v48 = vmul.f32 %v1594_v49, %v539_v56  ;;  %v558_v7 = vmul.f32 %v1594_v49, %v540_v12  ;;  %v1200_v49 = vld [vmem:[%s2160_s7 + $0x5] ss:$8 sm:$0x3] }
 0x18d   : > { %v582_v10 = vsel %vm581_vm4, %v570_v18, %v576_v4  ;;  %v585_v63 = vsel %vm581_vm4, %v576_v4, %v570_v18  ;;  %v495_v4 = vmul.f32 %v1588_v47, %v474_v31  ;;  %v496_v18 = vmul.f32 %v1588_v47, %v475_v16 }
 0x18e   : > { %v601_v3 = vmul.f32 %v1798_v9, %v585_v63  ;;  %v602_v61 = vmul.f32 %v1801_v6, %v582_v10  ;;  %v1842_v63 = vmul.f32 %v1770_v0, %v1582_v46  ;;  %v1855_v46 = vmul.f32 %v1773_v2, %v1628_v57 }
 0x18f   : > { %v1858_v54 = vrot.slane %v1200_v49, %v1746_v43  ;;  %v1861_v21 = vrot.slane %v1200_v49, %v1748_v44 }
 0x190   : > { %v619_v13 = vmul.f32 %v1604_v51, %v601_v3  ;;  %v620_v19 = vmul.f32 %v1604_v51, %v602_v61  ;;  %v1835_v11 = vpop.permute.xlu1 %924  ;;  %v638_v56 = vpop.permute.xlu0 %637  ;;  %v563_v51 = vadd.f32 %v557_v48, %v495_v4  ;;  %v564_v61 = vadd.f32 %v558_v7, %v496_v18  ;;  %v1202_v4 = vld [vmem:[%s2160_s7 + $0x7] ss:$8 sm:$0x3] }
 0x191   : > { %v644_v26 = vsel %vm643_vm5, %v1730_v32, %v638_v56  ;;  %v647_v47 = vsel %vm643_vm5, %v638_v56, %v1730_v32  ;;  %v1201_v32 = vld [vmem:[%s2160_s7 + $0x6] ss:$8 sm:$0x3] }
 0x192   : > { %v663_v3 = vmul.f32 %v1820_v52, %v647_v47  ;;  %v664_v12 = vmul.f32 %v1823_v39, %v644_v26  ;;  %v625_v31 = vadd.f32 %v619_v13, %v563_v51  ;;  %v626_v16 = vadd.f32 %v620_v19, %v564_v61 }
 0x193   : > { %v1885_v26 = vrot.slane %v1201_v32, %v1746_v43  ;;  %v1888_v47 = vrot.slane %v1201_v32, %v1748_v44  ;;  %v1894_v61 = vrot.slane %v1202_v4, %v1746_v43 }
 0x194   : > { %v681_v10 = vmul.f32 %v1554_v23, %v663_v3  ;;  %v682_v48 = vmul.f32 %v1554_v23, %v664_v12  ;;  %v450_v57 = vpop.permute.xlu1 %449  ;;  %v743_v7 = vpop.permute.xlu0 %742 }
 0x195   : > { %v457_v18 = vsel %vm455_vm2, %v1728_v22, %v450_v57  ;;  %v460_v56 = vsel %vm455_vm2, %v450_v57, %v1728_v22  ;;  %v749_v13 = vsel %vm748_vm6, %v1734_v34, %v743_v7  ;;  %v752_v23 = vsel %vm748_vm6, %v743_v7, %v1734_v34 }
 0x196   : > { %v687_v19 = vadd.f32 %v681_v10, %v625_v31  ;;  %v688_v49 = vadd.f32 %v682_v48, %v626_v16  ;;  %v768_v51 = vmul.f32 %v1858_v54, %v749_v13  ;;  %v769_v22 = vmul.f32 %v1861_v21, %v752_v23 }
 0x197   : > { %v476_v3 = vmul.f32 %v1779_v14, %v460_v56  ;;  %v477_v34 = vmul.f32 %v1782_v35, %v457_v18  ;;  %v1203_v18 = vld [vmem:[%s2160_s7 + $0x10] ss:$8 sm:$0x3]  ;;  %v1920_v23 = vrot.slane %v1202_v4, %v1748_v44 }
 0x198   : > { %v731_v12 = vadd.f32 %v725_v58, %v688_v49  ;;  %v730_v31 = vadd.f32 %v724_v25, %v687_v19  ;;  %v516_v16 = vpop.permute.xlu1 %515  ;;  %v805_v10 = vpop.permute.xlu0 %804  ;;  %v786_v32 = vmul.f32 %v1562_v27, %v768_v51  ;;  %v787_v48 = vmul.f32 %v1562_v27, %v769_v22 }
 0x199   : > { %v521_v57 = vsel %vm519_vm3, %v1732_v33, %v516_v16  ;;  %v524_v7 = vsel %vm519_vm3, %v516_v16, %v1732_v33  ;;  %v811_v27 = vsel %vm810_vm7, %v1738_v37, %v805_v10  ;;  %v814_v56 = vsel %vm810_vm7, %v805_v10, %v1738_v37 }
 0x19a   : > { %v541_v25 = vmul.f32 %v1764_v60, %v524_v7  ;;  %v542_v58 = vmul.f32 %v1767_v62, %v521_v57  ;;  %v830_v13 = vmul.f32 %v1885_v26, %v811_v27  ;;  %v831_v33 = vmul.f32 %v1888_v47, %v814_v56 }
 0x19b   : > { %v497_v19 = vmul.f32 %v1720_v15, %v476_v3  ;;  %v498_v49 = vmul.f32 %v1720_v15, %v477_v34  ;;  %v1926_v16 = vrot.slane %v1203_v18, %v1746_v43  ;;  %v1929_v37 = vrot.slane %v1203_v18, %v1748_v44 }
 0x19c   : > { %v578_v51 = vpop.permute.xlu1 %577  ;;  %v867_v22 = vpop.permute.xlu0 %866  ;;  %v792_v10 = vadd.f32 %v786_v32, %v730_v31  ;;  %v793_v57 = vadd.f32 %v787_v48, %v731_v12  ;;  %v559_v15 = vmul.f32 %v1556_v24, %v541_v25  ;;  %v560_v34 = vmul.f32 %v1556_v24, %v542_v58 }
 0x19d   : > { %v583_v4 = vsel %vm581_vm4, %v1736_v36, %v578_v51  ;;  %v586_v3 = vsel %vm581_vm4, %v578_v51, %v1736_v36  ;;  %v848_v44 = vmul.f32 %v1564_v28, %v830_v13  ;;  %v849_v12 = vmul.f32 %v1564_v28, %v831_v33 }
 0x19e   : > { %v603_v43 = vmul.f32 %v1798_v9, %v586_v3  ;;  %v604_v7 = vmul.f32 %v1801_v6, %v583_v4  ;;  %v873_v31 = vsel %vm872_vm8, %v1742_v41, %v867_v22  ;;  %v876_v36 = vsel %vm872_vm8, %v867_v22, %v1742_v41 }
 0x19f   : > { %v892_v48 = vmul.f32 %v1894_v61, %v873_v31  ;;  %v893_v18 = vmul.f32 %v1920_v23, %v876_v36  ;;  %v565_v56 = vadd.f32 %v559_v15, %v497_v19  ;;  %v566_v13 = vadd.f32 %v560_v34, %v498_v49 }
 0x1a0   : > { %v621_v32 = vmul.f32 %v1612_v53, %v603_v43  ;;  %v622_v24 = vmul.f32 %v1612_v53, %v604_v7  ;;  %v640_v25 = vpop.permute.xlu1 %639  ;;  %v929_v58 = vpop.permute.xlu0 %928  ;;  %v854_v43 = vadd.f32 %v848_v44, %v792_v10  ;;  %v855_v7 = vadd.f32 %v849_v12, %v793_v57 }
 0x1a1   : > { %v645_v28 = vsel %vm643_vm5, %v1740_v40, %v640_v25  ;;  %v648_v27 = vsel %vm643_vm5, %v640_v25, %v1740_v40  ;;  %v935_v41 = vsel %vm934_vm9, %v1726_v20, %v929_v58  ;;  %v938_v53 = vsel %vm934_vm9, %v929_v58, %v1726_v20 }
 0x1a2   : > { %v910_v33 = vmul.f32 %v1568_v30, %v892_v48  ;;  %v911_v51 = vmul.f32 %v1568_v30, %v893_v18  ;;  %v665_v22 = vmul.f32 %v1820_v52, %v648_v27  ;;  %v666_v4 = vmul.f32 %v1823_v39, %v645_v28 }
 0x1a3   : > { %v954_v40 = vmul.f32 %v1926_v16, %v935_v41  ;;  %v955_v3 = vmul.f32 %v1929_v37, %v938_v53  ;;  %v627_v31 = vadd.f32 %v621_v32, %v565_v56  ;;  %v628_v36 = vadd.f32 %v622_v24, %v566_v13 }
 0x1a4   : > { %v745_v25 = vpop.permute.xlu1 %744  ;;  %v1971_v20 = vpop.permute.xlu0 %740  ;;  %v683_v19 = vmul.f32 %v1622_v55, %v665_v22  ;;  %v684_v49 = vmul.f32 %v1622_v55, %v666_v4  ;;  %v916_v34 = vadd.f32 %v910_v33, %v854_v43  ;;  %v917_v48 = vadd.f32 %v911_v51, %v855_v7 }
 0x1a5   : > { %v972_v30 = vmul.f32 %v1566_v29, %v954_v40  ;;  %v973_v15 = vmul.f32 %v1566_v29, %v955_v3  ;;  %v750_v10 = vsel %vm748_vm6, %v1756_v50, %v745_v25  ;;  %v753_v57 = vsel %vm748_vm6, %v745_v25, %v1756_v50 }
 0x1a6   : > { %v689_v44 = vadd.f32 %v683_v19, %v627_v31  ;;  %v690_v12 = vadd.f32 %v684_v49, %v628_v36  ;;  %v770_v32 = vmul.f32 %v1858_v54, %v750_v10  ;;  %v771_v55 = vmul.f32 %v1861_v21, %v753_v57 }
 0x1a7   : > { %v979_v29 = vadd.f32 %v973_v15, %v917_v48  ;;  %v978_v58 = vadd.f32 %v972_v30, %v916_v34  ;;  %v726_v28 = vmul.f32 %v1640_v59, %v1842_v63  ;;  %v727_v27 = vmul.f32 %v1640_v59, %v1855_v46 }
 0x1a8   : > { %v807_v24 = vpop.permute.xlu1 %806  ;;  %v1985_v18 = vpop.permute.xlu0 %864  ;;  %v788_v59 = vmul.f32 %v1654_v1, %v770_v32  ;;  %v789_v46 = vmul.f32 %v1654_v1, %v771_v55 }
 0x1a9   : > { %v812_v50 = vsel %vm810_vm7, %v1784_v38, %v807_v24  ;;  %v815_v41 = vsel %vm810_vm7, %v807_v24, %v1784_v38  ;;  %v1003_v53 = vadd.f32 %v1724_v17, %v979_v29  ;;  %v1002_v56 = vadd.f32 %v1724_v17, %v978_v58 }
 0x1aa   : > { %v832_v13 = vmul.f32 %v1885_v26, %v812_v50  ;;  %v833_v33 = vmul.f32 %v1888_v47, %v815_v41  ;;  %v732_v63 = vadd.f32 %v726_v28, %v689_v44  ;;  %v733_v51 = vadd.f32 %v727_v27, %v690_v12  ;;  %v2192_v44 = vld [vmem:[#allocation15_spill] sm:$0xff] }
 0x1ab   : > { %v1009_v58 = vmax.f32 %v1003_v53, 0.0  ;;  %v1008_v28 = vmax.f32 %v1002_v56, 0.0 }
 0x1ac   : > { %v869_v22 = vpop.permute.xlu1 %868  ;;  %v452_v4 = vpop.permute.xlu0 %451  ;;  %v850_v40 = vmul.f32 %v1672_v5, %v832_v13  ;;  %v851_v3 = vmul.f32 %v1672_v5, %v833_v33  ;;  %v794_v31 = vadd.f32 %v788_v59, %v732_v63  ;;  %v795_v1 = vadd.f32 %v789_v46, %v733_v51 }
 0x1ad   : > { %v874_v38 = vsel %vm872_vm8, %v1812_v45, %v869_v22  ;;  %v877_v17 = vsel %vm872_vm8, %v869_v22, %v1812_v45  ;;  %v1015_v46 = vmin.f32 %v1009_v58, 6.0  ;;  %v1014_v22 = vmin.f32 %v1008_v28, 6.0  ;;  %v2198_v58 = vld [vmem:[#allocation10_spill] sm:$0xff] }
 0x1ae   : > { %v894_v43 = vmul.f32 %v1894_v61, %v874_v38  ;;  %v895_v7 = vmul.f32 %v1920_v23, %v877_v17  ;;  %v856_v30 = vadd.f32 %v850_v40, %v794_v31  ;;  %v857_v15 = vadd.f32 %v851_v3, %v795_v1 }
 0x1af   : > { %v710_v28 = vmul.f32 %v1770_v0, %v2198_v58 }
 0x1b0   : > { %v912_v36 = vmul.f32 %v1688_v8, %v894_v43  ;;  %v913_v25 = vmul.f32 %v1688_v8, %v895_v7  ;;  %v931_v19 = vpop.permute.xlu1 %930  ;;  %v518_v49 = vpop.permute.xlu0 %517 }
 0x1b1   : > { %v936_v45 = vsel %vm934_vm9, %v1835_v11, %v931_v19  ;;  %v939_v5 = vsel %vm934_vm9, %v931_v19, %v1835_v11  ;;  %v2193_v11 = vld [vmem:[#allocation17_spill] sm:$0xff] }
 0x1b2   : > { %v956_v34 = vmul.f32 %v1926_v16, %v936_v45  ;;  %v957_v48 = vmul.f32 %v1929_v37, %v939_v5  ;;  %v918_v10 = vadd.f32 %v912_v36, %v856_v30  ;;  %v919_v57 = vadd.f32 %v913_v25, %v857_v15  ;;  %v2195_v30 = vld [vmem:[#allocation8_spill] sm:$0xff] }
 0x1b4   : > { %v974_v8 = vmul.f32 %v2192_v44, %v956_v34  ;;  %v975_v12 = vmul.f32 %v2192_v44, %v957_v48  ;;  %v446_v32 = vpop.permute.xlu1 %445  ;;  %v580_v55 = vpop.permute.xlu0 %579 }
 0x1b5   : > { %v458_v51 = vsel %vm455_vm2, %v446_v32, %v452_v4  ;;  %v461_v59 = vsel %vm455_vm2, %v452_v4, %v446_v32  ;;  %v2197_v32 = vld [vmem:[#allocation11_spill] sm:$0xff] }
 0x1b6   : > { %v981_v24 = vadd.f32 %v975_v12, %v919_v57  ;;  %v980_v29 = vadd.f32 %v974_v8, %v918_v10  ;;  %v478_v7 = vmul.f32 %v1779_v14, %v461_v59  ;;  %v479_v31 = vmul.f32 %v1782_v35, %v458_v51 }
 0x1b8   : > { %v512_v27 = vpop.permute.xlu1 %511  ;;  %v1005_v50 = vadd.f32 %v2193_v11, %v981_v24  ;;  %v1004_v41 = vadd.f32 %v2193_v11, %v980_v29  ;;  %v642_v63 = vpop.permute.xlu0 %641  ;;  %v499_v35 = vmul.f32 %v2195_v30, %v478_v7  ;;  %v500_v15 = vmul.f32 %v2195_v30, %v479_v31  ;;  %v2202_v31 = vld [vmem:[#allocation16_spill] sm:$0xff] }
 0x1b9   : > { %v522_v13 = vsel %vm519_vm3, %v512_v27, %v518_v49  ;;  %v525_v33 = vsel %vm519_vm3, %v518_v49, %v512_v27  ;;  %v2194_v49 = vld [vmem:[#allocation6_spill] sm:$0xff]  ;;  %v2199_v27 = vld [vmem:[#allocation12_spill] sm:$0xff] }
 0x1ba   : > { %v1011_v53 = vmax.f32 %v1005_v50, 0.0  ;;  %v1010_v56 = vmax.f32 %v1004_v41, 0.0  ;;  %v543_v38 = vmul.f32 %v1764_v60, %v525_v33  ;;  %v544_v17 = vmul.f32 %v1767_v62, %v522_v13 }
 0x1bb   : > { %v711_v11 = vmul.f32 %v1773_v2, %v2199_v27  ;;  %v1300_v27 = vld [vmem:[%s1490_s25] sm:$0xff]  ;;  %s1301_s25 = scalar_lea.vmem %s2113_s19, 128 }
 0x1bc   : > { %v574_v40 = vpop.permute.xlu1 %573  ;;  %v1017_v3 = vmin.f32 %v1011_v53, 6.0  ;;  %v1016_v43 = vmin.f32 %v1010_v56, 6.0  ;;  %v927_v60 = vpop.permute.xlu0 %926  ;;  %v561_v45 = vmul.f32 %v2194_v49, %v543_v38  ;;  %v562_v5 = vmul.f32 %v2194_v49, %v544_v17  ;;  %v2200_v56 = vld [vmem:[#allocation13_spill] sm:$0xff]  ;;  %p1302_p11 = scmp.ne.s32.totalorder %s2113_s19, %s1301_s25  ;;  %p1309_p1 = scmp.lt.s32.totalorder %s1307_s26, %s1301_s25 }
 0x1bd   : > { %v584_v1 = vsel %vm581_vm4, %v574_v40, %v580_v55  ;;  %v587_v4 = vsel %vm581_vm4, %v580_v55, %v574_v40 }
 0x1be   : > { %v605_v36 = vmul.f32 %v1798_v9, %v587_v4  ;;  %v606_v25 = vmul.f32 %v1801_v6, %v584_v1  ;;  %v1212_v19 = vpack.c.bf16 %v1017_v3, %v1015_v46  ;;  %v1214_v62 = vpack.c.bf16 %v1016_v43, %v1014_v22  ;;  %v2196_v6 = vld [vmem:[#allocation9_spill] sm:$0xff]  ;;  %v2201_v3 = vld [vmem:[#allocation14_spill] sm:$0xff]  ;;  %p1303_p12 = pnand %p1302_p11, %p1467_p5  ;;  %p1310_p2 = por %p1309_p1, %p1308_p0 }
 0x1bf   : > { %v567_v8 = vadd.f32 %v561_v45, %v499_v35  ;;  %v568_v12 = vadd.f32 %v562_v5, %v500_v15  ;;  %v728_v46 = vmul.f32 %v2200_v56, %v710_v28  ;;  %v729_v22 = vmul.f32 %v2200_v56, %v711_v11 }
 0x1c0   : > { %v636_v14 = vpop.permute.xlu1 %635  ;;  %1213 = vmatprep.subr.bf16.mxu1 %v1212_v19  ;;  %v623_v48 = vmul.f32 %v2196_v6, %v605_v36  ;;  %v624_v10 = vmul.f32 %v2196_v6, %v606_v25  ;;  %v809_v50 = vpop.permute.xlu0 %808  ;;  %p1304_p13 = pneg %p1303_p12 }
 0x1c1   : > { %v646_v34 = vsel %vm643_vm5, %v636_v14, %v642_v63  ;;  %v649_v9 = vsel %vm643_vm5, %v642_v63, %v636_v14  ;;  %1215 = vmatpush1.bf16.msra.mxu1 %v1214_v62  ;;  %v2203_v62 = vld [vmem:[#allocation7_spill] sm:$0xff] }
 0x1c2   : > { %v667_v57 = vmul.f32 %v1820_v52, %v649_v9  ;;  %v668_v44 = vmul.f32 %v1823_v39, %v646_v34  ;;  %v629_v41 = vadd.f32 %v623_v48, %v567_v8  ;;  %v630_v13 = vadd.f32 %v624_v10, %v568_v12  ;;  %p1311_p3 = pnand %p1310_p2, %p1304_p13 }
 0x1c4   : > { %v685_v55 = vmul.f32 %v2197_v32, %v667_v57  ;;  %v686_v24 = vmul.f32 %v2197_v32, %v668_v44  ;;  %v803_v29 = vpop.permute.xlu1 %802 }
 0x1c5   : > { %v813_v52 = vsel %vm810_vm7, %v803_v29, %v809_v50  ;;  %v816_v39 = vsel %vm810_vm7, %v809_v50, %v803_v29  ;;  %v2205_v50 = vld [vmem:[#allocation5_spill] sm:$0xff] }
 0x1c6   : > { %v691_v33 = vadd.f32 %v685_v55, %v629_v41  ;;  %v692_v63 = vadd.f32 %v686_v24, %v630_v13  ;;  %v834_v59 = vmul.f32 %v1885_v26, %v813_v52  ;;  %v835_v53 = vmul.f32 %v1888_v47, %v816_v39 }
 0x1c8   : > { %v747_v51 = vpop.permute.xlu1 %746  ;;  %v734_v40 = vadd.f32 %v728_v46, %v691_v33  ;;  %v735_v26 = vadd.f32 %v729_v22, %v692_v63  ;;  %v852_v1 = vmul.f32 %v2202_v31, %v834_v59  ;;  %v853_v4 = vmul.f32 %v2202_v31, %v835_v53 }
 0x1c9   : > { %v751_v0 = vsel %vm748_vm6, %v1971_v20, %v747_v51  ;;  %v754_v2 = vsel %vm748_vm6, %v747_v51, %v1971_v20 }
 0x1ca   : > { %v772_v38 = vmul.f32 %v1858_v54, %v751_v0  ;;  %v773_v17 = vmul.f32 %v1861_v21, %v754_v2 }
 0x1cc   : > { %v790_v47 = vmul.f32 %v2201_v3, %v772_v38  ;;  %v791_v43 = vmul.f32 %v2201_v3, %v773_v17  ;;  %v871_v7 = vpop.permute.xlu1 %870 }
 0x1cd   : > { %v875_v20 = vsel %vm872_vm8, %v1985_v18, %v871_v7  ;;  %v878_v54 = vsel %vm872_vm8, %v871_v7, %v1985_v18 }
 0x1ce   : > { %v796_v21 = vadd.f32 %v790_v47, %v734_v40  ;;  %v797_v36 = vadd.f32 %v791_v43, %v735_v26  ;;  %v896_v25 = vmul.f32 %v1894_v61, %v875_v20  ;;  %v897_v19 = vmul.f32 %v1920_v23, %v878_v54  ;;  %v2204_v23 = vld [vmem:[#allocation18_spill] sm:$0xff] }
 0x1d0   : > { %v914_v49 = vmul.f32 %v2203_v62, %v896_v25  ;;  %v915_v45 = vmul.f32 %v2203_v62, %v897_v19  ;;  %v933_v5 = vpop.permute.xlu1 %932  ;;  %v858_v14 = vadd.f32 %v852_v1, %v796_v21  ;;  %v859_v30 = vadd.f32 %v853_v4, %v797_v36 }
 0x1d1   : > { %v937_v35 = vsel %vm934_vm9, %v927_v60, %v933_v5  ;;  %v940_v15 = vsel %vm934_vm9, %v933_v5, %v927_v60  ;;  %v1000_v44 = vpop.permute.xlu0 %999 }
 0x1d2   : > { %v958_v18 = vmul.f32 %v1926_v16, %v937_v35  ;;  %v959_v34 = vmul.f32 %v1929_v37, %v940_v15  ;;  %v920_v61 = vadd.f32 %v914_v49, %v858_v14  ;;  %v921_v9 = vadd.f32 %v915_v45, %v859_v30  ;;  %v1020_v37 = vld [vmem:[%s2158_s5] sm:$0xf] }
 0x1d4   : > { %v976_v6 = vmul.f32 %v2204_v23, %v958_v18  ;;  %v977_v48 = vmul.f32 %v2204_v23, %v959_v34 }
 0x1d6   : > { %v982_v10 = vadd.f32 %v976_v6, %v920_v61  ;;  %v983_v57 = vadd.f32 %v977_v48, %v921_v9 }
 0x1d8   : > { %v1006_v8 = vadd.f32 %v1000_v44, %v982_v10  ;;  %v1007_v12 = vadd.f32 %v1000_v44, %v983_v57 }
 0x1da   : > { %v1012_v32 = vmax.f32 %v1006_v8, 0.0  ;;  %v1013_v42 = vmax.f32 %v1007_v12, 0.0 }
 0x1dc   : > { %v1018_v60 = vmin.f32 %v1012_v32, 6.0  ;;  %v1019_v16 = vmin.f32 %v1013_v42, 6.0 }
 0x1de   : > { %1035 = vmatprep.subr.mxu1 %v1019_v16 }
 0x1df   : > { %1036 = vmatpush1.msra.mxu1 %v1018_v60 }
 0x1e0   : > { %1204 = vmatmul.mubr.msk.f32.vlgmr.msra.gmra.mrb[0].mxu1 %vm1027_vm10, %v1020_v37 }
 0x1e1   : > { %v1025_v55 = vpop.permute.xlu1 %1024 }
 0x2b3   : > { %v1097_v24 = vpop.f32.mrb[0].mxu1 }
 0x2b4   : > { %v1098_v29 = vadd.f32 %v1097_v24, %v1025_v55  ;;  %v1099_v58 = vpop.f32.mrb[1].mxu1 }
 0x2b5   : > { %v1100_v28 = vadd.f32 %v1099_v58, %v1025_v55 }
 0x2b6   : > { %v1103_v11 = vadd.f32 %v1300_v27, %v1098_v29 }
 0x2b7   : > { %v1104_v41 = vadd.f32 %v1100_v28, %v2205_v50 }
 0x2b9   : > { %v1107_v13 = vcombine.low %v1103_v11, %v1104_v41 }
 0x2bb   : > { %1109 = vst [vmem:[%s298_s18] sm:$0xff] %v1107_v13 }
 0x2bc   : > { %1314 = shalt.err (!%p1311_p3)
}
 0x2bd   : > { %s1315_s10 = scalar_lea.hbm %s2111_s22, 128  ;;  %s1319_s17 = scalar_lea.hbm %s2161_s8, 256 }
 0x2be   : > { %p1316_p4 = scmp.ne.s32.totalorder %s2111_s22, %s1315_s10  ;;  %p1320_p9 = scmp.lt.u32.totalorder %s2111_s22, %s2161_s8 }
 0x2bf   : > { %p1321_p10 = scmp.lt.u32.totalorder %s1319_s17, %s1315_s10  ;;  %p1323_p12 = scmp.lt.u32.totalorder %s1315_s10, %s2111_s22 }
 0x2c0   : > { %p1317_p7 = pnand %p1316_p4, %p1467_p5 }
 0x2c1   : > { %p1322_p11 = por %p1321_p10, %p1320_p9 }
 0x2c2   : > { %p1318_p8 = pneg %p1317_p7 }
 0x2c3   : > { %p1324_p13 = por %p1323_p12, %p1322_p11 }
 0x2c5   : > { %p1325_p0 = pnand %p1324_p13, %p1318_p8 }
 0x2c7   : > { %1328 = shalt.err (!%p1325_p0)
}
 0x2c8   : > { %1216 = dma.vmem_to_hbm [thread:$0]  (%p1467_p5), %s2113_s19, 128, %s2111_s22, %s1111_s23  }
 0x2c9 PF: > { %p1222_p1 = scmp.ge.s32.totalorder %s1363_s30, 2  ;;  %s1137_s21 = sand.u32 1, %s1351_s27  }
 0x2ca   : > { %s1138_s25 = scalar_lea.sflag [#allocation3], %s1137_s21 }
 0x2cb   : > { %p1219_p2 = pnand %p1222_p1, %p1471_p6 }
 0x2cd   : > { %1346 = dma.done.wait (!%p1219_p2), %s1138_s25, 128  }
 0x2ce   : > { %1348 = vsyncadd (!%p1219_p2), %s1138_s25, 4294967168  ;;  %p18_p3 = scmp.ge.s32.totalorder %s1454_s11, 4   ;;  %s2206_s27 = smov %s1355_s28 }
 0x2cf   : > { %s2207_s28 = smov %s1359_s29  ;;  %s2208_s29 = smov %s1465_s14 }
 0x2d0   : > { %s2209_s30 = smov %s1454_s11  ;;  %20 = sbr.rel (!%p18_p3) target bundleno = 3 (0x3), region = 95 }
 0x2d7   :  { %1143 = vsyncpa [#allocation3], 1 }
 0x2d8   :  { %1145 = vsyncpa [#allocation3 + $0x1], 1 }

</bundles_post_ra>
